<compile_context>
chip_gen: v7x
topology: tpu7x:2x2x1
jax: 0.10.0
libtpu: 0.0.40
codegen_flags: <defaults>
</compile_context>

<pallas_src>
import math

import jax
import jax.numpy as jnp
from jax.experimental import pallas as pl
from jax.experimental.pallas import tpu as pltpu

MAGIC = 0.00057339936
EPS = 1e-6


# ----------------------------------------------------------------------------
# Pallas kernel
# ----------------------------------------------------------------------------
def make_wpdc_kernel(n_batch, n_param, kpad):
    inv_count = 1.0 / float(n_batch * n_param)

    def kernel(inp_ref, tgt_ref, consts_ref, ub_ref, wbt_ref, o_ref):
        inp = inp_ref[...]                       # (N, 62)  whitened input params
        tgt = tgt_ref[...]                       # (N, 62)  whitened target params

        std = consts_ref[0:1, :]                 # (1, 62)
        mean = consts_ref[1:2, :]                # (1, 62)
        base_mult = consts_ref[2:3, :]           # offset_norm @ cols 3,7; MAGIC*w_norm @ 12:
        sel_x = consts_ref[3:4, :]               # 1.0 @ pose cols 0,4,8
        sel_y = consts_ref[4:5, :]               # 1.0 @ pose cols 1,5,9
        sel_z = consts_ref[5:6, :]               # 1.0 @ pose cols 2,6,10
        eps_row = consts_ref[6:7, :]             # EPS everywhere except col 11

        # re-whiten (de-normalize) -- keep all elementwise math f32 (v5e-safe)
        inp_d = inp * std + mean
        tgt_d = tgt * std + mean
        diff_abs = jnp.abs(inp_d - tgt_d)        # (N, 62)

        # Fused resampled-vertex matmul: one (N,62)@(62,3*Kpad) bf16 MXU dot
        # with an f32 accumulator (pose rows of wbt are zero -> exact).
        t = jnp.dot(inp_d.astype(jnp.bfloat16), wbt_ref[...],
                    preferred_element_type=jnp.float32) + ub_ref[...]  # (N, 3*Kpad)
        tsq = t * t

        # per-coordinate vertex norms: static 128-aligned lane slices + reduce
        tn_x = jnp.sqrt(jnp.sum(tsq[:, :kpad], axis=1, keepdims=True))          # (N, 1)
        tn_y = jnp.sqrt(jnp.sum(tsq[:, kpad:2 * kpad], axis=1, keepdims=True))  # (N, 1)
        tn_z = jnp.sqrt(jnp.sum(tsq[:, 2 * kpad:], axis=1, keepdims=True))      # (N, 1)

        # column-wise multiplier built from precomputed selector rows:
        #   pose cols 0,4,8 -> tn_x ; 1,5,9 -> tn_y ; 2,6,10 -> tn_z
        #   pose cols 3,7   -> offset_norm (in base_mult)
        #   col 11          -> 0
        #   cols 12..61     -> MAGIC * w_norm (in base_mult)
        mult = base_mult + sel_x * tn_x + sel_y * tn_y + sel_z * tn_z  # (N, 62)
        weights = diff_abs * mult + eps_row                            # col 11 exactly 0

        maxes = jnp.max(weights, axis=1, keepdims=True)
        weights = weights * pl.reciprocal(maxes, approx=True)

        loss = jnp.sum(weights * (inp - tgt) ** 2) * inv_count
        o_ref[0, 0] = loss

    return kernel


def wpdc_loss_pallas(inp, tgt, consts, ub, wbt):
    n, p = inp.shape
    kpad = wbt.shape[1] // 3
    kernel = make_wpdc_kernel(n, p, kpad)
    out = pl.pallas_call(
        kernel,
        out_shape=jax.ShapeDtypeStruct((1, 1), jnp.float32),
        in_specs=[pl.BlockSpec(memory_space=pltpu.MemorySpace.VMEM)] * 5,
        out_specs=pl.BlockSpec(memory_space=pltpu.MemorySpace.SMEM),
    )(inp, tgt, consts, ub, wbt)
    return out[0, 0]


# ----------------------------------------------------------------------------
# Host-side packing of all static operands
# ----------------------------------------------------------------------------
def pack_wpdc_operands(param_std, param_mean, u_base, w_shp_base, w_exp_base):
    p = param_std.shape[0]                      # 62
    k = w_shp_base.shape[0]                     # 3 * Kv
    kv = k // 3
    n_se = w_shp_base.shape[1] + w_exp_base.shape[1]   # 50
    kpad = max(128, ((kv + 127) // 128) * 128)  # pad each coord block to 128 lanes
    offset_norm = math.sqrt(kv)

    # basis as one lane-dense (62, 3*Kpad) bf16 matrix: column c*Kpad + v holds
    # coordinate c of resampled vertex v; pose rows 0..11 and pad columns are 0.
    w_base = jnp.concatenate([w_shp_base, w_exp_base], axis=1)          # (K, 50)
    core = w_base.reshape(kv, 3, n_se).transpose(2, 1, 0)               # (50, 3, Kv)
    core_pad = jnp.zeros((n_se, 3, kpad), jnp.float32).at[:, :, :kv].set(core)
    wbt = (jnp.zeros((p, 3 * kpad), jnp.float32)
           .at[12:, :].set(core_pad.reshape(n_se, 3 * kpad))
           ).astype(jnp.bfloat16)                                        # (62, 3*Kpad)

    ub3 = u_base.reshape(kv, 3).T                                        # (3, Kv)
    ub = (jnp.zeros((3, kpad), jnp.float32).at[:, :kv].set(ub3)
          ).reshape(1, 3 * kpad)                                         # (1, 3*Kpad) f32

    # per-column norms of [w_shp_base, w_exp_base]
    w_norm = jnp.sqrt(jnp.sum(w_base ** 2, axis=0))                      # (50,)

    cols = jnp.arange(p)
    pose = cols < 11
    sel_x = jnp.where(pose & (cols % 4 == 0), 1.0, 0.0)
    sel_y = jnp.where(pose & (cols % 4 == 1), 1.0, 0.0)
    sel_z = jnp.where(pose & (cols % 4 == 2), 1.0, 0.0)
    base_mult = jnp.where(pose & (cols % 4 == 3), offset_norm, 0.0)
    base_mult = base_mult.at[12:].set(MAGIC * w_norm)
    eps_row = jnp.where(cols == 11, 0.0, EPS)

    consts = jnp.stack(
        [param_std, param_mean, base_mult, sel_x, sel_y, sel_z, eps_row,
         jnp.zeros((p,), jnp.float32)], axis=0).astype(jnp.float32)      # (8, 62)
    return consts, ub, wbt


# ----------------------------------------------------------------------------
# Pure-JAX reference (mirrors the PyTorch forward)
# ----------------------------------------------------------------------------
def wpdc_loss_ref(inp, tgt, std, mean, u_base, w_shp_base, w_exp_base):
    hi = jax.lax.Precision.HIGHEST
    inp_d = inp * std + mean
    tgt_d = tgt * std + mean
    n = inp.shape[0]
    alpha_shp = inp_d[:, 12:52]
    alpha_exp = inp_d[:, 52:]
    tmpv = (u_base[None, :]
            + jnp.matmul(alpha_shp, w_shp_base.T, precision=hi)
            + jnp.matmul(alpha_exp, w_exp_base.T, precision=hi))        # (N, K)
    tmpv3 = tmpv.reshape(n, -1, 3).transpose(0, 2, 1)                   # (N, 3, Kv)
    tmpv_norm = jnp.sqrt(jnp.sum(tmpv3 ** 2, axis=2))                   # (N, 3)
    k = w_shp_base.shape[0]
    offset_norm = math.sqrt(k // 3)

    diff_pose = jnp.abs(inp_d[:, :11] - tgt_d[:, :11])
    weights = jnp.zeros_like(inp)
    for ind in range(11):
        if ind in (0, 4, 8):
            m = tmpv_norm[:, 0]
        elif ind in (1, 5, 9):
            m = tmpv_norm[:, 1]
        elif ind in (2, 6, 10):
            m = tmpv_norm[:, 2]
        else:
            m = offset_norm
        weights = weights.at[:, ind].set(diff_pose[:, ind] * m)

    w = jnp.concatenate([w_shp_base, w_exp_base], axis=1)
    w_norm = jnp.sqrt(jnp.sum(w ** 2, axis=0))
    diff_se = jnp.abs(inp_d[:, 12:] - tgt_d[:, 12:])
    weights = weights.at[:, 12:].set(MAGIC * diff_se * w_norm[None, :])
    weights = weights.at[:, :11].add(EPS)
    weights = weights.at[:, 12:].add(EPS)
    maxes = jnp.max(weights, axis=1, keepdims=True)
    weights = weights / maxes
    weights = weights.at[:, 11].set(0.0)
    return jnp.mean(weights * (inp - tgt) ** 2)


# ----------------------------------------------------------------------------
# Driver
# ----------------------------------------------------------------------------
if __name__ == "__main__":
    key = jax.random.PRNGKey(0)
    ks = jax.random.split(key, 8)

    N = 2            # batch
    P = 62           # 12 pose + 40 shape + 10 expression
    V = 100          # synthetic number of model vertices (real model: 53215)
    NSHP, NEXP = 40, 10
    N_LMK = 17       # synthetic keypoint landmarks (real model: 68)
    RESAMPLE = 16    # synthetic resample_num (real default: 132)

    # deterministic synthetic "checkpoint" buffers
    param_mean = jax.random.normal(ks[0], (P,), jnp.float32) * 0.1
    param_std = jax.random.uniform(ks[1], (P,), jnp.float32, minval=0.05, maxval=0.5)
    u = jax.random.normal(ks[2], (3 * V,), jnp.float32) * 5.0
    w_shp = jax.random.normal(ks[3], (3 * V, NSHP), jnp.float32)
    w_exp = jax.random.normal(ks[4], (3 * V, NEXP), jnp.float32)

    landmarks = jnp.arange(N_LMK, dtype=jnp.int32) * 5
    keypoints = (landmarks[:, None] * 3 + jnp.arange(3, dtype=jnp.int32)[None, :]).reshape(-1)

    # TODO(synk): torch.randperm re-draws indices each call; here we use a fixed
    # deterministic jax.random permutation (host-side glue, not in the kernel).
    perm = jax.random.permutation(ks[5], V)[:RESAMPLE].astype(jnp.int32)
    resample = (perm[:, None] * 3 + jnp.arange(3, dtype=jnp.int32)[None, :]).reshape(-1)
    keypoints_mix = jnp.concatenate([keypoints, resample])

    # gather the resampled basis (glue, plain JAX)
    w_shp_base = w_shp[keypoints_mix]            # (K, 40)
    w_exp_base = w_exp[keypoints_mix]            # (K, 10)
    u_base = u[keypoints_mix]                    # (K,)

    # host-side packing: 3 operands total beyond inp/tgt
    consts, ub, wbt = pack_wpdc_operands(param_std, param_mean, u_base,
                                         w_shp_base, w_exp_base)

    # whitened example inputs
    inp = jax.random.normal(ks[6], (N, P), jnp.float32)
    tgt = jax.random.normal(ks[7], (N, P), jnp.float32)

    loss = wpdc_loss_pallas(inp, tgt, consts, ub, wbt)
    loss = jax.block_until_ready(loss)

    ref = wpdc_loss_ref(inp, tgt, param_std[None, :], param_mean[None, :],
                        u_base, w_shp_base, w_exp_base)
    ref = jax.block_until_ready(ref)

    assert jnp.isfinite(loss), "kernel produced non-finite loss"
    assert jnp.allclose(loss, ref, rtol=2e-2, atol=1e-6), (loss, ref)
    print("KERNEL_OK")
</pallas_src>

<mosaic_0001>
module attributes {stable_mosaic.version = 11 : i64} {
  func.func @kernel(%arg0: memref<2x62xf32, #tpu.memory_space<vmem>>, %arg1: memref<2x62xf32, #tpu.memory_space<vmem>>, %arg2: memref<8x62xf32, #tpu.memory_space<vmem>>, %arg3: memref<1x384xf32, #tpu.memory_space<vmem>>, %arg4: memref<62x384xbf16, #tpu.memory_space<vmem>>, %arg5: memref<1x1xf32, #tpu.memory_space<smem>>) attributes {dimension_semantics = [], scalar_prefetch = 0 : i64, scratch_operands = 0 : i64, tpu.core_type = #tpu.core_type<tc>} {
    %c0 = arith.constant 0 : index
    %c0_0 = arith.constant 0 : index
    %0 = vector.load %arg0[%c0, %c0_0] : memref<2x62xf32, #tpu.memory_space<vmem>>, vector<2x62xf32>
    %c0_1 = arith.constant 0 : index
    %c0_2 = arith.constant 0 : index
    %1 = vector.load %arg1[%c0_1, %c0_2] : memref<2x62xf32, #tpu.memory_space<vmem>>, vector<2x62xf32>
    %c0_3 = arith.constant 0 : index
    %c0_4 = arith.constant 0 : index
    %2 = vector.load %arg2[%c0_3, %c0_4] : memref<8x62xf32, #tpu.memory_space<vmem>>, vector<1x62xf32>
    %c1 = arith.constant 1 : index
    %c0_5 = arith.constant 0 : index
    %3 = vector.load %arg2[%c1, %c0_5] : memref<8x62xf32, #tpu.memory_space<vmem>>, vector<1x62xf32>
    %c2 = arith.constant 2 : index
    %c0_6 = arith.constant 0 : index
    %4 = vector.load %arg2[%c2, %c0_6] : memref<8x62xf32, #tpu.memory_space<vmem>>, vector<1x62xf32>
    %c3 = arith.constant 3 : index
    %c0_7 = arith.constant 0 : index
    %5 = vector.load %arg2[%c3, %c0_7] : memref<8x62xf32, #tpu.memory_space<vmem>>, vector<1x62xf32>
    %c4 = arith.constant 4 : index
    %c0_8 = arith.constant 0 : index
    %6 = vector.load %arg2[%c4, %c0_8] : memref<8x62xf32, #tpu.memory_space<vmem>>, vector<1x62xf32>
    %c5 = arith.constant 5 : index
    %c0_9 = arith.constant 0 : index
    %7 = vector.load %arg2[%c5, %c0_9] : memref<8x62xf32, #tpu.memory_space<vmem>>, vector<1x62xf32>
    %c6 = arith.constant 6 : index
    %c0_10 = arith.constant 0 : index
    %8 = vector.load %arg2[%c6, %c0_10] : memref<8x62xf32, #tpu.memory_space<vmem>>, vector<1x62xf32>
    %9 = vector.broadcast %2 : vector<1x62xf32> to vector<2x62xf32>
    %10 = arith.mulf %0, %9 : vector<2x62xf32>
    %11 = vector.broadcast %3 : vector<1x62xf32> to vector<2x62xf32>
    %12 = arith.addf %10, %11 : vector<2x62xf32>
    %13 = vector.broadcast %2 : vector<1x62xf32> to vector<2x62xf32>
    %14 = arith.mulf %1, %13 : vector<2x62xf32>
    %15 = vector.broadcast %3 : vector<1x62xf32> to vector<2x62xf32>
    %16 = arith.addf %14, %15 : vector<2x62xf32>
    %17 = arith.subf %12, %16 : vector<2x62xf32>
    %18 = math.absf %17 : vector<2x62xf32>
    %19 = arith.truncf %12 : vector<2x62xf32> to vector<2x62xbf16>
    %c0_11 = arith.constant 0 : index
    %c0_12 = arith.constant 0 : index
    %20 = vector.load %arg4[%c0_11, %c0_12] : memref<62x384xbf16, #tpu.memory_space<vmem>>, vector<62x384xbf16>
    %cst = arith.constant dense<0.000000e+00> : vector<2x384xf32>
    %21 = tpu.matmul %19, %20, %cst {dimension_numbers = #tpu.dot_dimension_numbers<[1], [0], [0], [1], [0, 0, 1, 1], [], []>} : vector<2x62xbf16>, vector<62x384xbf16>, vector<2x384xf32> -> vector<2x384xf32>
    %c0_13 = arith.constant 0 : index
    %c0_14 = arith.constant 0 : index
    %22 = vector.load %arg3[%c0_13, %c0_14] : memref<1x384xf32, #tpu.memory_space<vmem>>, vector<1x384xf32>
    %23 = vector.broadcast %22 : vector<1x384xf32> to vector<2x384xf32>
    %24 = arith.addf %21, %23 : vector<2x384xf32>
    %25 = arith.mulf %24, %24 : vector<2x384xf32>
    %26 = vector.extract_strided_slice %25 {offsets = [0, 0], sizes = [2, 128], strides = [1, 1]} : vector<2x384xf32> to vector<2x128xf32>
    %cst_15 = arith.constant dense<0.000000e+00> : vector<2xf32>
    %27 = vector.multi_reduction <add>, %26, %cst_15 [1] : vector<2x128xf32> to vector<2xf32>
    %28 = vector.shape_cast %27 : vector<2xf32> to vector<2x1xf32>
    %29 = math.sqrt %28 : vector<2x1xf32>
    %30 = vector.extract_strided_slice %25 {offsets = [0, 128], sizes = [2, 128], strides = [1, 1]} : vector<2x384xf32> to vector<2x128xf32>
    %cst_16 = arith.constant dense<0.000000e+00> : vector<2xf32>
    %31 = vector.multi_reduction <add>, %30, %cst_16 [1] : vector<2x128xf32> to vector<2xf32>
    %32 = vector.shape_cast %31 : vector<2xf32> to vector<2x1xf32>
    %33 = math.sqrt %32 : vector<2x1xf32>
    %34 = vector.extract_strided_slice %25 {offsets = [0, 256], sizes = [2, 128], strides = [1, 1]} : vector<2x384xf32> to vector<2x128xf32>
    %cst_17 = arith.constant dense<0.000000e+00> : vector<2xf32>
    %35 = vector.multi_reduction <add>, %34, %cst_17 [1] : vector<2x128xf32> to vector<2xf32>
    %36 = vector.shape_cast %35 : vector<2xf32> to vector<2x1xf32>
    %37 = math.sqrt %36 : vector<2x1xf32>
    %38 = vector.broadcast %5 : vector<1x62xf32> to vector<2x62xf32>
    %39 = vector.broadcast %29 : vector<2x1xf32> to vector<2x62xf32>
    %40 = arith.mulf %38, %39 : vector<2x62xf32>
    %41 = vector.broadcast %4 : vector<1x62xf32> to vector<2x62xf32>
    %42 = arith.addf %41, %40 : vector<2x62xf32>
    %43 = vector.broadcast %6 : vector<1x62xf32> to vector<2x62xf32>
    %44 = vector.broadcast %33 : vector<2x1xf32> to vector<2x62xf32>
    %45 = arith.mulf %43, %44 : vector<2x62xf32>
    %46 = arith.addf %42, %45 : vector<2x62xf32>
    %47 = vector.broadcast %7 : vector<1x62xf32> to vector<2x62xf32>
    %48 = vector.broadcast %37 : vector<2x1xf32> to vector<2x62xf32>
    %49 = arith.mulf %47, %48 : vector<2x62xf32>
    %50 = arith.addf %46, %49 : vector<2x62xf32>
    %51 = arith.mulf %18, %50 : vector<2x62xf32>
    %52 = vector.broadcast %8 : vector<1x62xf32> to vector<2x62xf32>
    %53 = arith.addf %51, %52 : vector<2x62xf32>
    %cst_18 = arith.constant dense<0xFF800000> : vector<2xf32>
    %54 = vector.multi_reduction <maximumf>, %53, %cst_18 [1] : vector<2x62xf32> to vector<2xf32>
    %55 = vector.shape_cast %54 : vector<2xf32> to vector<2x1xf32>
    %56 = tpu.reciprocal %55 {approx = true} : vector<2x1xf32> -> vector<2x1xf32>
    %57 = vector.broadcast %56 : vector<2x1xf32> to vector<2x62xf32>
    %58 = arith.mulf %53, %57 : vector<2x62xf32>
    %59 = arith.subf %0, %1 : vector<2x62xf32>
    %60 = arith.mulf %59, %59 : vector<2x62xf32>
    %61 = arith.mulf %58, %60 : vector<2x62xf32>
    %62 = vector.shape_cast %61 : vector<2x62xf32> to vector<1x2x62xf32>
    %cst_19 = arith.constant dense<0.000000e+00> : vector<1xf32>
    %63 = vector.multi_reduction <add>, %62, %cst_19 [1, 2] : vector<1x2x62xf32> to vector<1xf32>
    %64 = vector.shape_cast %63 : vector<1xf32> to vector<1x1x1xf32>
    %65 = vector.extract %64[0, 0, 0] : f32 from vector<1x1x1xf32>
    %cst_20 = arith.constant 0.00806451589 : f32
    %66 = arith.mulf %65, %cst_20 : f32
    %c0_21 = arith.constant 0 : index
    %c0_22 = arith.constant 0 : index
    %67 = memref.load %arg5[%c0_21, %c0_22] : memref<1x1xf32, #tpu.memory_space<smem>>
    memref.store %66, %arg5[%c0_21, %c0_22] : memref<1x1xf32, #tpu.memory_space<smem>>
    return
  }
}

</mosaic_0001>

<bundles_post_ra>
// kernel: tpu_custom_call.1
= control target key start
LH: loop header
LB: loop body
LE: loop exit
PB: predicated region body
PF: predicated region fallthrough
CT: control target
= control target key end

     0   :  { %10 = vsyncpa [#allocation3], 0  ;;  %s632_s0 = inlined_call_operand.hbm [shape: f32[2,62], index: 0, kind: input, shape index: {}]   ;;  %s633_s1 = inlined_call_operand.vmem [shape: f32[2,62], index: 1, kind: input, shape index: {}]   ;;  %s634_s2 = inlined_call_operand.hbm [shape: f32[8,62], index: 2, kind: input, shape index: {}]   ;;  %s635_s3 = inlined_call_operand.vmem [shape: f32[1,384], index: 3, kind: input, shape index: {}]   ;;  %s636_s4 = inlined_call_operand.hbm [shape: bf16[62,384], index: 4, kind: input, shape index: {}]   ;;  %s637_s5 = inlined_call_operand.hbm [shape: f32[1,1], index: 5, kind: output, shape index: {}]  }
   0x1   :  { %11 = vsyncpa [#allocation6], 0 }
   0x2   :  { %12 = vsyncpa [#allocation4], 0  ;;  %s527_s18 = smov [#allocation5]   ;;  %s528_s20 = smov [#allocation2]  }
   0x3   :  { %s31_s19 = sshll.u32 %s527_s18, 4  ;;  %s19_s21 = sshll.u32 %s528_s20, 4  ;;  %s32_s19 = int_to_ptr.vmem [resolvable:$true] %s31_s19  ;;  %s20_s21 = int_to_ptr.vmem [resolvable:$true] %s19_s21 }
   0x4   :  { %s445_s24 = scalar_lea.hbm %s634_s2, 128 }
   0x5   :  { %p446_p0 = scmp.ne.s32.totalorder %s634_s2, %s445_s24  ;;  %p449_p1 = scmp.lt.u32.totalorder %s445_s24, %s634_s2 }
   0x7   :  { %p451_p2 = pnand %p449_p1, %p446_p0 }
   0x9   :  { %454 = shalt.err (!%p451_p2)
}
   0xa   :  { %s455_s29 = scalar_lea.vmem %s32_s19, 128  ;;  %p460_p4 = scmp.lt.s32.totalorder %s32_s19, %s32_s19 }
   0xb   :  { %p456_p3 = scmp.ne.s32.totalorder %s32_s19, %s455_s29  ;;  %p461_p5 = scmp.lt.s32.totalorder %s455_s29, %s455_s29 }
   0xd   :  { %p462_p6 = por %p461_p5, %p460_p4 }
   0xf   :  { %p463_p7 = pnand %p462_p6, %p456_p3 }
  0x11   :  { %466 = shalt.err (!%p463_p7)
}
  0x12   :  { %34 = dma.hbm_to_vmem [thread:$0]  %s634_s2, 128, %s32_s19, [#allocation6]  }
  0x13   :  { %s467_s9 = scalar_lea.hbm %s632_s0, 32 }
  0x14   :  { %p468_p8 = scmp.ne.s32.totalorder %s632_s0, %s467_s9  ;;  %p471_p9 = scmp.lt.u32.totalorder %s467_s9, %s632_s0 }
  0x16   :  { %p473_p10 = pnand %p471_p9, %p468_p8 }
  0x18   :  { %476 = shalt.err (!%p473_p10)
}
  0x19   :  { %s477_s14 = scalar_lea.vmem %s20_s21, 32  ;;  %p482_p12 = scmp.lt.s32.totalorder %s20_s21, %s20_s21 }
  0x1a   :  { %p478_p11 = scmp.ne.s32.totalorder %s20_s21, %s477_s14  ;;  %p483_p13 = scmp.lt.s32.totalorder %s477_s14, %s477_s14 }
  0x1c   :  { %p484_p0 = por %p483_p13, %p482_p12 }
  0x1e   :  { %p485_p1 = pnand %p484_p0, %p478_p11 }
  0x20   :  { %488 = shalt.err (!%p485_p1)
}
  0x21   :  { %22 = dma.hbm_to_vmem [thread:$0]  %s632_s0, 32, %s20_s21, [#allocation3]  }
  0x22   :  { %s529_s16 = smov [#allocation7]   ;;  %s489_s20 = scalar_lea.hbm %s636_s4, 1536 }
  0x23   :  { %s42_s17 = sshll.u32 %s529_s16, 4  ;;  %p490_p2 = scmp.ne.s32.totalorder %s636_s4, %s489_s20  ;;  %s43_s17 = int_to_ptr.vmem [resolvable:$true] %s42_s17 }
  0x24   :  { %p493_p3 = scmp.lt.u32.totalorder %s489_s20, %s636_s4 }
  0x26   :  { %p495_p4 = pnand %p493_p3, %p490_p2 }
  0x28   :  { %498 = shalt.err (!%p495_p4)
}
  0x29   :  { %s499_s26 = scalar_lea.vmem %s43_s17, 1536  ;;  %p504_p6 = scmp.lt.s32.totalorder %s43_s17, %s43_s17 }
  0x2a   :  { %p500_p5 = scmp.ne.s32.totalorder %s43_s17, %s499_s26  ;;  %p505_p7 = scmp.lt.s32.totalorder %s499_s26, %s499_s26 }
  0x2c   :  { %p506_p8 = por %p505_p7, %p504_p6 }
  0x2e   :  { %p507_p9 = pnand %p506_p8, %p500_p5 }
  0x30   :  { %510 = shalt.err (!%p507_p9)
}
  0x31   :  { %s530_s0 = smov 192   ;;  %s531_s21 = smov 12  }
  0x32   :  { %48 = dma.hbm_to_vmem [thread:$0]  %s636_s4, 1536, %s43_s17, [#allocation6], %s530_s0, %s530_s0, %s531_s21  }
  0x33   :  { %521 = dma.done.wait [#allocation3], 32  }
  0x34   :  { %522 = vsyncadd [#allocation3], 4294967264 }
  0x35   :  { %523 = dma.done.wait [#allocation6], 1664  }
  0x36   :  { %524 = vsyncadd [#allocation6], 4294965632  ;;  %v532_v0 = vmov 0.0   ;;  %vm533_vm0 = vmmov 0   ;;  %v534_v1 = vmov 0   ;;  %vm181_vm1 = vcmask 1046528  }
  0x37   :  { %398 = vmatprep.subr.bf16.mxu1 %v532_v0  ;;  %406 = vmatprep.mubr.msk.bf16.mxu1 %vm533_vm0, %v532_v0  ;;  %v421_v2 = vld [vmem:[#allocation7 + $0x4] ss:$12 sps:$4 sm:$0xff]   ;;  %v423_v3 = vld [vmem:[#allocation7 + $0x8] ss:$12 sps:$4 sm:$0xff]   ;;  %v424_v4 = vld [vmem:[#allocation7] ss:$12 sps:$4 sm:$0xff]   ;;  %v101_v22 = vlaneseq }
  0x38   :  { %223 = vmatprep.mubr.bf16.mxu0 %v534_v1  ;;  %191 = vmatprep.subr.bf16.mxu0 %v421_v2  ;;  %v425_v5 = vld [vmem:[#allocation7 + $0x1c] ss:$12 sps:$4 sm:$0xff]   ;;  %v427_v6 = vld [vmem:[#allocation7 + $0x20] ss:$12 sps:$4 sm:$0xff]   ;;  %v428_v7 = vld [vmem:[#allocation7 + $0x18] ss:$12 sps:$4 sm:$0xff]  }
  0x39   :  { %399 = vmatpush3.bf16.msra.mxu1 %v423_v3  ;;  %192 = vmatpush1.bf16.msra.mxu0 %v424_v4  ;;  %v429_v8 = vld [vmem:[#allocation7 + $0x34] ss:$12 sps:$4 sm:$0xff]   ;;  %v431_v9 = vld [vmem:[#allocation7 + $0x38] ss:$12 sps:$4 sm:$0xff]   ;;  %v432_v10 = vld [vmem:[#allocation7 + $0x30] ss:$12 sps:$4 sm:$0xff]  }
  0x3a   :  { %400 = vmatprep.subr.bf16.mxu1 %v532_v0  ;;  %193 = vmatprep.subr.bf16.mxu0 %v425_v5  ;;  %v433_v11 = vld [vmem:[#allocation7 + $0x4c] ss:$12 sps:$4 sm:$0x7f]   ;;  %v602_v12 = vld [vmem:[#allocation2] sm:$0x3]  ;;  %vm177_vm2 = vcmask 506880  }
  0x3b   :  { %v435_v13 = vld [vmem:[#allocation7 + $0x50] ss:$12 sps:$4 sm:$0x7f]   ;;  %v436_v14 = vld [vmem:[#allocation7 + $0x48] ss:$12 sps:$4 sm:$0x7f]  }
  0x3c   :  { %v371_v15 = vld [vmem:[#allocation5] ss:$0 sm:$0xff]  ;;  %v372_v16 = vld [vmem:[#allocation5 + $0x1] ss:$0 sm:$0xff]  ;;  %v189_v18 = vsel %vm181_vm1, %v435_v13, 0  ;;  %v183_v19 = vsel %vm181_vm1, %v436_v14, 0 }
  0x3d   :  { %401 = vmatpush3.bf16.msra.mxu1 %v427_v6  ;;  %194 = vmatpush1.bf16.msra.mxu0 %v428_v7  ;;  %v72_v17 = vmul.f32 %v371_v15, %v602_v12  ;;  %v102_v23 = vshrl.u32 %v101_v22, 7  ;;  %v99_v25 = vld [vmem:[%s635_s3] sm:$0x7]  ;;  %vm275_vm3 = vcmask 1041408   ;;  %v388_v58 = vld [vmem:[#allocation5 + $0x3] ss:$0 sm:$0xff] }
  0x3e   :  { %402 = vmatprep.subr.bf16.mxu1 %v532_v0  ;;  %195 = vmatprep.subr.bf16.mxu0 %v429_v8  ;;  %v60_v51 = vld [vmem:[%s633_s1] sm:$0x3]  ;;  %v390_v5 = vld [vmem:[#allocation5 + $0x4] ss:$0 sm:$0xff]  ;;  %v391_v8 = vld [vmem:[#allocation5 + $0x5] ss:$0 sm:$0xff] }
  0x3f   :  { %v608_v20 = vadd.f32 %v372_v16, %v72_v17  ;;  %v111_v24 = vsub.s32 2, %v102_v23  ;;  %v103_v26 = vsub.s32 0, %v102_v23  ;;  %v107_v27 = vsub.s32 1, %v102_v23  ;;  %s511_s9 = scalar_lea.hbm %s637_s5, 16 }
  0x40   :  { %v78_v53 = vmul.f32 %v371_v15, %v60_v51  ;;  %vm334_vm10 = vcmask 500736   ;;  %p512_p10 = scmp.ne.s32.totalorder %s637_s5, %s511_s9  ;;  %p515_p11 = scmp.lt.u32.totalorder %s511_s9, %s637_s5 }
  0x41   :  { %403 = vmatpush3.bf16.msra.mxu1 %v431_v9  ;;  %196 = vmatpush1.bf16.msra.mxu0 %v432_v10  ;;  %v82_v21 = vpack.c.bf16 %v608_v20, %v608_v20  ;;  %v112_v28 = vrot.slane %v99_v25, %v111_v24  ;;  %v104_v29 = vrot.slane %v99_v25, %v103_v26 }
  0x42   :  { %404 = vmatprep.subr.bf16.mxu1 %v532_v0  ;;  %385 = vmatprep.subr.msk.bf16.mxu0 %vm181_vm1, %v433_v11  ;;  %v108_v30 = vrot.slane %v99_v25, %v107_v27  ;;  %v79_v60 = vadd.f32 %v372_v16, %v78_v53  ;;  %v389_v0 = vld [vmem:[#allocation5 + $0x2] ss:$0 sm:$0xff]  ;;  %p517_p12 = pnand %p515_p11, %p512_p10 }
  0x44   :  { %v80_v7 = vsub.f32 %v608_v20, %v79_v60  ;;  %v340_v20 = vsub.f32 %v602_v12, %v60_v51 }
  0x45   :  { %405 = vmatpush3.bf16.msra.mxu1 %v189_v18  ;;  %198 = vmatpush1.bf16.msra.mxu0 %v183_v19  ;;  %v392_v18 = vld [vmem:[#allocation5 + $0x6] ss:$0 sm:$0xff] }
  0x46   :  { %v81_v14 = vand.u32 2147483647, %v80_v7  ;;  %v341_v24 = vmul.f32 %v340_v20, %v340_v20 }
  0x48   :  { %407 = vmatmul.mubr.msk.bf16.vlgmr.msra.gmra.mrb[0].mxu1 %vm177_vm2, %v82_v21  ;;  %386 = vmatmul.mubr.msk.bf16.vlgmr.msra.gmra.mrb[0].mxu0 %vm177_vm2, %v82_v21 }
 0x11b   :  { %v266_v31 = vpop.f32.mrb[0].mxu1  ;;  %v225_v33 = vpop.f32.mrb[0].mxu0 }
 0x11c   :  { %v267_v32 = vadd.f32 %v266_v31, %v112_v28  ;;  %v408_v34 = vpop.f32.mrb[1].mxu1  ;;  %v226_v35 = vadd.f32 %v225_v33, %v104_v29  ;;  %v227_v36 = vpop.f32.mrb[1].mxu0 }
 0x11d   :  { %v269_v37 = vpop.f32.mrb[2].mxu1  ;;  %v228_v39 = vadd.f32 %v227_v36, %v108_v30  ;;  %v229_v40 = vpop.f32.mrb[2].mxu0 }
 0x11e   :  { %v274_v38 = vmul.f32 %v267_v32, %v267_v32  ;;  %v409_v41 = vpop.f32.mrb[3].mxu1  ;;  %v272_v42 = vmul.f32 %v226_v35, %v226_v35  ;;  %v230_v43 = vpop.f32.mrb[3].mxu0 }
 0x11f   :  { %v273_v45 = vmul.f32 %v228_v39, %v228_v39 }
 0x120   :  { %v296_v44 = vsel %vm275_vm3, %v274_v38, 0.0  ;;  %v276_v46 = vsel %vm275_vm3, %v272_v42, 0.0 }
 0x121   :  { %297 = vadd.xlane.f32.xlu1 %v296_v44  ;;  %277 = vadd.xlane.f32.xlu0 %v276_v46  ;;  %v286_v47 = vsel %vm275_vm3, %v273_v45, 0.0 }
 0x125   :  { %287 = vadd.xlane.f32.xlu0 %v286_v47 }
 0x1ae   :  { %v298_v48 = vpop.xlane.xlu1 %297  ;;  %v278_v49 = vpop.xlane.xlu0 %277 }
 0x1af   :  { %437 = vrsqrt.f32 %v298_v48  ;;  %vm281_vm4 = vcmp.eq.f32.partialorder %v278_v49, inf  ;;  %v284_v57 = vand.u32 2147483648, %v278_v49  ;;  %vm283_vm5 = vcmp.eq.f32.partialorder %v278_v49, 0.0 }
 0x1b0   :  { %439 = vrsqrt.f32 %v278_v49  ;;  %vm301_vm6 = vcmp.eq.f32.partialorder %v298_v48, inf  ;;  %v304_v3 = vand.u32 2147483648, %v298_v48  ;;  %vm303_vm9 = vcmp.eq.f32.partialorder %v298_v48, 0.0 }
 0x1b2   :  { %v288_v50 = vpop.xlane.xlu0 %287 }
 0x1b3   :  { %441 = vrsqrt.f32 %v288_v50  ;;  %vm291_vm7 = vcmp.eq.f32.partialorder %v288_v50, inf  ;;  %v294_v4 = vand.u32 2147483648, %v288_v50  ;;  %vm293_vm8 = vcmp.eq.f32.partialorder %v288_v50, 0.0 }
 0x1b9   :  { %v438_v52 = vpop.eup %437 }
 0x1ba   :  { %v440_v54 = vpop.eup %439  ;;  %v300_v55 = vmul.f32 %v438_v52, %v298_v48 }
 0x1bb   :  { %v280_v56 = vmul.f32 %v440_v54, %v278_v49 }
 0x1bc   :  { %v302_v1 = vsel %vm301_vm6, %v298_v48, %v300_v55 }
 0x1bd   :  { %v282_v59 = vsel %vm281_vm4, %v278_v49, %v280_v56  ;;  %v442_v61 = vpop.eup %441  ;;  %v305_v10 = vsel %vm303_vm9, %v304_v3, %v302_v1 }
 0x1be   :  { %v285_v62 = vsel %vm283_vm5, %v284_v57, %v282_v59  ;;  %v290_v63 = vmul.f32 %v442_v61, %v288_v50  ;;  %v326_v16 = vmul.f32 %v391_v8, %v305_v10 }
 0x1bf   :  { %v310_v2 = vmul.f32 %v388_v58, %v285_v62 }
 0x1c0   :  { %v292_v6 = vsel %vm291_vm7, %v288_v50, %v290_v63 }
 0x1c1   :  { %v295_v9 = vsel %vm293_vm8, %v294_v4, %v292_v6  ;;  %v315_v11 = vadd.f32 %v389_v0, %v310_v2 }
 0x1c2   :  { %v320_v13 = vmul.f32 %v390_v5, %v295_v9 }
 0x1c4   :  { %v321_v15 = vadd.f32 %v320_v13, %v315_v11 }
 0x1c6   :  { %v327_v17 = vadd.f32 %v326_v16, %v321_v15 }
 0x1c8   :  { %v328_v19 = vmul.f32 %v327_v17, %v81_v14 }
 0x1ca   :  { %v333_v21 = vadd.f32 %v392_v18, %v328_v19 }
 0x1cc   :  { %v335_v22 = vsel %vm334_vm10, %v333_v21, -inf }
 0x1cd   :  { %336 = vmax.xlane.f32.xlu1 %v335_v22 }
 0x25a   :  { %v337_v23 = vpop.xlane.xlu1 %336 }
 0x25b   :  { %443 = vrcp.f32 %v337_v23 }
 0x265   :  { %v444_v25 = vpop.eup %443 }
 0x266   :  { %v339_v26 = vmul.f32 %v444_v25, %v333_v21 }
 0x268   :  { %v342_v27 = vmul.f32 %v341_v24, %v339_v26 }
 0x26a   :  { %v343_v28 = vsel %vm334_vm10, %v342_v27, 0.0 }
 0x26b   :  { %344 = vadd.xlane.f32.xlu0 %v343_v28 }
 0x2f8   :  { %v345_v29 = vpop.xlane.xlu0 %344 }
 0x2f9   :  { %v346_v30 = vrot.slane %v345_v29, 4 }
 0x2fb   :  { %v347_v31 = vadd.f32 %v346_v30, %v345_v29 }
 0x2fd   :  { %v348_v32 = vrot.slane %v347_v31, 2 }
 0x2ff   :  { %v349_v33 = vadd.f32 %v348_v32, %v347_v31 }
 0x301   :  { %v350_v34 = vrot.slane %v349_v33, 1 }
 0x303   :  { %v351_v35 = vadd.f32 %v350_v34, %v349_v33 }
 0x305   :  { %410 = vpush %v351_v35 }
 0x336   :  { %s411_s1 = spop %410 }
 0x337   :  { %s353_s6 = smul.f32 0.008064516, %s411_s1 }
 0x339   :  { %355 = sst [smem:[#allocation8]] %s353_s6 }
 0x33a   :  { %520 = shalt.err (!%p517_p12)
}
 0x33b   :  { %s535_s14 = smov [#allocation8]  }
 0x33c   :  { %363 = dma.smem_to_hbm %s535_s14, 16, %s637_s5, [#allocation4]  }
 0x33d   :  { %525 = dma.done.wait [#allocation4], 16  }
 0x33e   :  { %526 = vsyncadd [#allocation4], 4294967280 }
 0x33f   :  { %367 = sfence }
 0x340   :  { %368 = vsyncpa [#allocation3], 1 }
 0x341   :  { %369 = vsyncpa [#allocation6], 1 }
 0x342   :  { %370 = vsyncpa [#allocation4], 1 }

</bundles_post_ra>
